<compile_context>
chip_gen: v5e
topology: v5e:2x2
jax: 0.10.0
libtpu: 0.0.40
codegen_flags: <defaults>
</compile_context>

<pallas_src>
import functools

import jax
import jax.numpy as jnp
from jax.experimental import pallas as pl
from jax.experimental.pallas import tpu as pltpu

# ------------------------- config (mirrors the torch config dict) ------------
CONFIG = dict(
    hidden_size=32,
    kernel_size=3,
    num_layers=2,
)


# ------------------------------ Pallas kernel --------------------------------
def _layernorm(x, gamma, beta, eps=1e-5):
    """torch.nn.LayerNorm over the last dim (biased variance, eps=1e-5)."""
    mean = jnp.mean(x, axis=-1, keepdims=True)
    xc = x - mean
    var = jnp.mean(xc * xc, axis=-1, keepdims=True)
    return xc * jax.lax.rsqrt(var + eps) * gamma + beta


def _stack_gated_cnn_kernel(num_layers, kernel_size,
                            x_ref, wconv_ref, ln1g_ref, ln1b_ref,
                            w2_ref, b2_ref, ln2g_ref, ln2b_ref,
                            out_ref, xpad_scr):
    """Whole StackGatedCNN forward for one batch tile, entirely in VMEM.

    x_ref     : (TILE_B, L, H)         activations (embeddings)
    wconv_ref : (NL, K*H, 2H)          fused cnn||gate conv weights (im2col layout)
    ln1g/b    : (NL, 1, H)             LayerNorm after gated-CNN
    w2_ref    : (NL, H, H)             ff_liner_layer2 weight ([in, out])
    b2_ref    : (NL, 1, H)             ff_liner_layer2 bias
    ln2g/b    : (NL, 1, H)             LayerNorm after feed-forward
    out_ref   : (TILE_B, L, H)
    xpad_scr  : (TILE_B, L + K - 1, H) VMEM scratch for 'same' padding
    """
    TB, L, H = x_ref.shape
    K = kernel_size
    pad = (K - 1) // 2

    # Zero the padded scratch once; the pad rows stay zero across all layers,
    # the middle rows are overwritten each layer.
    xpad_scr[...] = jnp.zeros_like(xpad_scr)

    x = x_ref[...].astype(jnp.float32)                       # (TB, L, H)

    for i in range(num_layers):                              # static unroll
        # ---- GatedCNN: both convs + all K taps as ONE im2col MXU matmul ------
        xpad_scr[:, pad:pad + L, :] = x
        cols = [xpad_scr[:, k:k + L, :].reshape(TB * L, H) for k in range(K)]
        xs = jnp.concatenate(cols, axis=-1)                  # (TB*L, K*H)
        ab = jnp.dot(xs, wconv_ref[i],
                     preferred_element_type=jnp.float32)     # (TB*L, 2H)
        gated = (ab[:, :H] * jax.nn.sigmoid(ab[:, H:])).reshape(TB, L, H)

        # ---- residual + LayerNorm (bn_after_gcnn) ----------------------------
        x = _layernorm(gated + x, ln1g_ref[i], ln1b_ref[i])

        # NOTE: the original torch forward also computes
        #   l1 = relu(ff_liner_layer1(x))
        # but never uses it, so it has no effect on the output and is omitted.
        l2 = jnp.dot(x.reshape(TB * L, H), w2_ref[i],
                     preferred_element_type=jnp.float32).reshape(TB, L, H)
        l2 = l2 + b2_ref[i]

        # ---- residual + LayerNorm (bn_after_ff) -------------------------------
        x = _layernorm(x + l2, ln2g_ref[i], ln2b_ref[i])

    out_ref[...] = x.astype(out_ref.dtype)


# ------------------------------ wrapper ---------------------------------------
def _pick_tile_b(B, target=8):
    """Largest divisor of B that is <= target (keeps per-program VMEM bounded)."""
    t = min(B, target)
    while B % t:
        t -= 1
    return t


def stack_gated_cnn_forward(x, params, config=CONFIG):
    """Pallas-backed StackGatedCNN forward.  x: (B, L, H) float32."""
    H = config["hidden_size"]
    K = config["kernel_size"]
    NL = config["num_layers"]
    assert K % 2 == 1, "torch-style 'same' padding only matches for odd kernel_size"
    B, L, Hx = x.shape
    assert Hx == H
    pad = (K - 1) // 2

    # Batch-tiled grid (at toy sizes this collapses to a single program).
    TILE_B = _pick_tile_b(B)
    nb = B // TILE_B

    kernel = functools.partial(_stack_gated_cnn_kernel, NL, K)

    # Advisory cost estimate for XLA's scheduler.
    flops = NL * (2 * B * L * (K * H) * (2 * H)      # fused conv matmul
                  + 2 * B * L * H * H                # feed-forward matmul
                  + 20 * B * L * H)                  # gating / LN elementwise
    transcendentals = NL * B * L * (H + 2)           # sigmoid + 2 rsqrt per row
    bytes_accessed = 4 * (2 * x.size + params["w_conv"].size
                          + params["w_ff2"].size + 6 * NL * H)

    def wspec(shape):                                # whole-array weight block
        return pl.BlockSpec(shape, lambda i: (0, 0, 0))

    return pl.pallas_call(
        kernel,
        out_shape=jax.ShapeDtypeStruct((B, L, H), jnp.float32),
        grid=(nb,),
        in_specs=[
            pl.BlockSpec((TILE_B, L, H), lambda i: (i, 0, 0)),   # x (batch-tiled)
            wspec((NL, K * H, 2 * H)),                           # fused conv weight
            wspec((NL, 1, H)),                                   # ln1 gamma
            wspec((NL, 1, H)),                                   # ln1 beta
            wspec((NL, H, H)),                                   # ff2 weight
            wspec((NL, 1, H)),                                   # ff2 bias
            wspec((NL, 1, H)),                                   # ln2 gamma
            wspec((NL, 1, H)),                                   # ln2 beta
        ],
        out_specs=pl.BlockSpec((TILE_B, L, H), lambda i: (i, 0, 0)),
        scratch_shapes=[pltpu.VMEM((TILE_B, L + 2 * pad, H), jnp.float32)],
        compiler_params=pltpu.CompilerParams(
            dimension_semantics=("parallel",)),
        cost_estimate=pl.CostEstimate(flops=int(flops),
                                      transcendentals=int(transcendentals),
                                      bytes_accessed=int(bytes_accessed)),
    )(x, params["w_conv"], params["ln1_g"], params["ln1_b"],
      params["w_ff2"], params["b_ff2"], params["ln2_g"], params["ln2_b"])


# ------------------------------ params ----------------------------------------
def init_params(key, config=CONFIG):
    H, K, NL = config["hidden_size"], config["kernel_size"], config["num_layers"]
    ks = jax.random.split(key, 8)

    # Fused conv weight, layout W[l, k*H + c_in, c_out] with the first H output
    # columns = self.cnn and the last H columns = self.gate
    # (i.e. torch Conv1d weights [out, in, K] transposed/flattened and concatenated).
    lim_c = 1.0 / (H * K) ** 0.5
    w_conv = jax.random.uniform(ks[0], (NL, K * H, 2 * H), jnp.float32, -lim_c, lim_c)

    # Linear layers, stored as [in, out] (transpose of torch's [out, in]).
    lim_l = 1.0 / H ** 0.5
    w_ff1 = jax.random.uniform(ks[1], (NL, H, H), jnp.float32, -lim_l, lim_l)
    b_ff1 = jax.random.uniform(ks[2], (NL, 1, H), jnp.float32, -lim_l, lim_l)
    w_ff2 = jax.random.uniform(ks[3], (NL, H, H), jnp.float32, -lim_l, lim_l)
    b_ff2 = jax.random.uniform(ks[4], (NL, 1, H), jnp.float32, -lim_l, lim_l)

    # LayerNorm affine params (torch default is ones/zeros; randomized slightly
    # here so the correctness check exercises the affine path).
    ln1_g = 1.0 + 0.1 * jax.random.normal(ks[5], (NL, 1, H), jnp.float32)
    ln1_b = 0.1 * jax.random.normal(ks[6], (NL, 1, H), jnp.float32)
    ln2_g = 1.0 + 0.1 * jax.random.normal(ks[7], (NL, 1, H), jnp.float32)
    ln2_b = 0.1 * jax.random.normal(ks[5], (NL, 1, H), jnp.float32)

    return dict(w_conv=w_conv,
                w_ff1=w_ff1, b_ff1=b_ff1,   # ff_liner_layer1: dead code in forward
                w_ff2=w_ff2, b_ff2=b_ff2,
                ln1_g=ln1_g, ln1_b=ln1_b, ln2_g=ln2_g, ln2_b=ln2_b)


# ------------------------------ pure-JAX reference -----------------------------
def reference_forward(x, params, config=CONFIG):
    H, K, NL = config["hidden_size"], config["kernel_size"], config["num_layers"]
    pad = (K - 1) // 2
    L = x.shape[1]

    def ln(v, g, b, eps=1e-5):
        m = jnp.mean(v, axis=-1, keepdims=True)
        c = v - m
        var = jnp.mean(c * c, axis=-1, keepdims=True)
        return c / jnp.sqrt(var + eps) * g + b

    for i in range(NL):
        xp = jnp.pad(x, ((0, 0), (pad, pad), (0, 0)))
        w = params["w_conv"][i].reshape(K, H, 2 * H)
        ab = 0.0
        for k in range(K):
            ab = ab + jnp.einsum("blh,ho->blo", xp[:, k:k + L, :], w[k])
        a, b = ab[..., :H], ab[..., H:]
        gated = a * jax.nn.sigmoid(b)
        x = ln(gated + x, params["ln1_g"][i], params["ln1_b"][i])
        # l1 = relu(x @ w_ff1 + b_ff1)  # dead code in the original forward
        l2 = jnp.einsum("blh,ho->blo", x, params["w_ff2"][i]) + params["b_ff2"][i]
        x = ln(x + l2, params["ln2_g"][i], params["ln2_b"][i])
    return x


# ------------------------------ main -------------------------------------------
if __name__ == "__main__":
    root = jax.random.PRNGKey(0)
    k_params, k_x = jax.random.split(root)

    params = init_params(k_params)

    B, L, H = 2, 8, CONFIG["hidden_size"]
    x = jax.random.normal(k_x, (B, L, H), jnp.float32)

    out = stack_gated_cnn_forward(x, params)
    out = jax.block_until_ready(out)

    ref = reference_forward(x, params)
    assert out.shape == (B, L, H)
    max_err = float(jnp.max(jnp.abs(out - ref)))
    assert jnp.allclose(out, ref, atol=1e-3, rtol=1e-3), f"max_err={max_err}"

    print("KERNEL_OK")
</pallas_src>

<mosaic_0001>
module attributes {stable_mosaic.version = 11 : i64} {
  func.func @_stack_gated_cnn_kernel(%arg0: i32, %arg1: memref<2x8x32xf32, #tpu.memory_space<vmem>>, %arg2: memref<2x96x64xf32, #tpu.memory_space<vmem>>, %arg3: memref<2x1x32xf32, #tpu.memory_space<vmem>>, %arg4: memref<2x1x32xf32, #tpu.memory_space<vmem>>, %arg5: memref<2x32x32xf32, #tpu.memory_space<vmem>>, %arg6: memref<2x1x32xf32, #tpu.memory_space<vmem>>, %arg7: memref<2x1x32xf32, #tpu.memory_space<vmem>>, %arg8: memref<2x1x32xf32, #tpu.memory_space<vmem>>, %arg9: memref<2x8x32xf32, #tpu.memory_space<vmem>>, %arg10: memref<2x10x32xf32, #tpu.memory_space<vmem>>) attributes {dimension_semantics = [#tpu.dimension_semantics<parallel>], iteration_bounds = array<i64: 1>, scalar_prefetch = 0 : i64, scratch_operands = 1 : i64, tpu.core_type = #tpu.core_type<tc>, window_params = [{transform_indices = @transform_0, window_bounds = array<i64: 2, 8, 32>}, {pipeline_mode = #tpu.pipeline_mode<synchronous>, transform_indices = @transform_1, window_bounds = array<i64: 2, 96, 64>}, {pipeline_mode = #tpu.pipeline_mode<synchronous>, transform_indices = @transform_2, window_bounds = array<i64: 2, 1, 32>}, {pipeline_mode = #tpu.pipeline_mode<synchronous>, transform_indices = @transform_3, window_bounds = array<i64: 2, 1, 32>}, {pipeline_mode = #tpu.pipeline_mode<synchronous>, transform_indices = @transform_4, window_bounds = array<i64: 2, 32, 32>}, {pipeline_mode = #tpu.pipeline_mode<synchronous>, transform_indices = @transform_5, window_bounds = array<i64: 2, 1, 32>}, {pipeline_mode = #tpu.pipeline_mode<synchronous>, transform_indices = @transform_6, window_bounds = array<i64: 2, 1, 32>}, {pipeline_mode = #tpu.pipeline_mode<synchronous>, transform_indices = @transform_7, window_bounds = array<i64: 2, 1, 32>}, {transform_indices = @transform_8, window_bounds = array<i64: 2, 8, 32>}]} {
    %cst = arith.constant 0.000000e+00 : f32
    %0 = vector.broadcast %cst : f32 to vector<2x10x32xf32>
    %c0 = arith.constant 0 : index
    %c0_0 = arith.constant 0 : index
    %c0_1 = arith.constant 0 : index
    %1 = vector.load %arg10[%c0, %c0_0, %c0_1] : memref<2x10x32xf32, #tpu.memory_space<vmem>>, vector<2x10x32xf32>
    tpu.vector_store %arg10[%c0, %c0_0, %c0_1], %0 {strides = array<i32>} : memref<2x10x32xf32, #tpu.memory_space<vmem>>, vector<2x10x32xf32>,
    %c0_2 = arith.constant 0 : index
    %c0_3 = arith.constant 0 : index
    %c0_4 = arith.constant 0 : index
    %2 = vector.load %arg1[%c0_2, %c0_3, %c0_4] : memref<2x8x32xf32, #tpu.memory_space<vmem>>, vector<2x8x32xf32>
    %c0_5 = arith.constant 0 : index
    %c1 = arith.constant 1 : index
    %c0_6 = arith.constant 0 : index
    %3 = vector.load %arg10[%c0_5, %c1, %c0_6] : memref<2x10x32xf32, #tpu.memory_space<vmem>>, vector<2x8x32xf32>
    tpu.vector_store %arg10[%c0_5, %c1, %c0_6], %2 {strides = array<i32>} : memref<2x10x32xf32, #tpu.memory_space<vmem>>, vector<2x8x32xf32>,
    %c0_7 = arith.constant 0 : index
    %c0_8 = arith.constant 0 : index
    %c0_9 = arith.constant 0 : index
    %4 = vector.load %arg10[%c0_7, %c0_8, %c0_9] : memref<2x10x32xf32, #tpu.memory_space<vmem>>, vector<2x8x32xf32>
    %5 = vector.shape_cast %4 : vector<2x8x32xf32> to vector<16x32xf32>
    %c0_10 = arith.constant 0 : index
    %c1_11 = arith.constant 1 : index
    %c0_12 = arith.constant 0 : index
    %6 = vector.load %arg10[%c0_10, %c1_11, %c0_12] : memref<2x10x32xf32, #tpu.memory_space<vmem>>, vector<2x8x32xf32>
    %7 = vector.shape_cast %6 : vector<2x8x32xf32> to vector<16x32xf32>
    %c0_13 = arith.constant 0 : index
    %c2 = arith.constant 2 : index
    %c0_14 = arith.constant 0 : index
    %8 = vector.load %arg10[%c0_13, %c2, %c0_14] : memref<2x10x32xf32, #tpu.memory_space<vmem>>, vector<2x8x32xf32>
    %9 = vector.shape_cast %8 : vector<2x8x32xf32> to vector<16x32xf32>
    %10 = tpu.concatenate %5, %7, %9 in 1 : vector<16x32xf32>, vector<16x32xf32>, vector<16x32xf32> -> vector<16x96xf32>
    %c0_15 = arith.constant 0 : index
    %c0_16 = arith.constant 0 : index
    %c0_17 = arith.constant 0 : index
    %11 = vector.load %arg2[%c0_15, %c0_16, %c0_17] : memref<2x96x64xf32, #tpu.memory_space<vmem>>, vector<1x96x64xf32>
    %12 = vector.shape_cast %11 : vector<1x96x64xf32> to vector<96x64xf32>
    %cst_18 = arith.constant dense<0.000000e+00> : vector<16x64xf32>
    %13 = tpu.matmul %10, %12, %cst_18 {dimension_numbers = #tpu.dot_dimension_numbers<[1], [0], [0], [1], [0, 0, 1, 1], [], []>} : vector<16x96xf32>, vector<96x64xf32>, vector<16x64xf32> -> vector<16x64xf32>
    %14 = vector.extract_strided_slice %13 {offsets = [0, 0], sizes = [16, 32], strides = [1, 1]} : vector<16x64xf32> to vector<16x32xf32>
    %15 = vector.extract_strided_slice %13 {offsets = [0, 32], sizes = [16, 32], strides = [1, 1]} : vector<16x64xf32> to vector<16x32xf32>
    %16 = arith.negf %15 : vector<16x32xf32>
    %17 = math.exp %16 : vector<16x32xf32>
    %cst_19 = arith.constant 1.000000e+00 : f32
    %18 = vector.broadcast %cst_19 : f32 to vector<16x32xf32>
    %19 = arith.addf %18, %17 : vector<16x32xf32>
    %20 = arith.divf %18, %19 : vector<16x32xf32>
    %21 = arith.mulf %14, %20 : vector<16x32xf32>
    %22 = vector.shape_cast %21 : vector<16x32xf32> to vector<2x8x32xf32>
    %23 = arith.addf %22, %2 : vector<2x8x32xf32>
    %c0_20 = arith.constant 0 : index
    %c0_21 = arith.constant 0 : index
    %c0_22 = arith.constant 0 : index
    %24 = vector.load %arg3[%c0_20, %c0_21, %c0_22] : memref<2x1x32xf32, #tpu.memory_space<vmem>>, vector<1x1x32xf32>
    %25 = vector.shape_cast %24 : vector<1x1x32xf32> to vector<1x32xf32>
    %c0_23 = arith.constant 0 : index
    %c0_24 = arith.constant 0 : index
    %c0_25 = arith.constant 0 : index
    %26 = vector.load %arg4[%c0_23, %c0_24, %c0_25] : memref<2x1x32xf32, #tpu.memory_space<vmem>>, vector<1x1x32xf32>
    %27 = vector.shape_cast %26 : vector<1x1x32xf32> to vector<1x32xf32>
    %cst_26 = arith.constant dense<0.000000e+00> : vector<2x8xf32>
    %28 = vector.multi_reduction <add>, %23, %cst_26 [2] : vector<2x8x32xf32> to vector<2x8xf32>
    %29 = vector.shape_cast %28 : vector<2x8xf32> to vector<2x8x1xf32>
    %cst_27 = arith.constant 3.200000e+01 : f32
    %30 = vector.broadcast %cst_27 : f32 to vector<2x8x1xf32>
    %31 = arith.divf %29, %30 : vector<2x8x1xf32>
    %32 = vector.broadcast %31 : vector<2x8x1xf32> to vector<2x8x32xf32>
    %33 = arith.subf %23, %32 : vector<2x8x32xf32>
    %34 = arith.mulf %33, %33 : vector<2x8x32xf32>
    %cst_28 = arith.constant dense<0.000000e+00> : vector<2x8xf32>
    %35 = vector.multi_reduction <add>, %34, %cst_28 [2] : vector<2x8x32xf32> to vector<2x8xf32>
    %36 = vector.shape_cast %35 : vector<2x8xf32> to vector<2x8x1xf32>
    %cst_29 = arith.constant 3.200000e+01 : f32
    %37 = vector.broadcast %cst_29 : f32 to vector<2x8x1xf32>
    %38 = arith.divf %36, %37 : vector<2x8x1xf32>
    %cst_30 = arith.constant 9.99999974E-6 : f32
    %39 = vector.broadcast %cst_30 : f32 to vector<2x8x1xf32>
    %40 = arith.addf %38, %39 : vector<2x8x1xf32>
    %41 = math.rsqrt %40 : vector<2x8x1xf32>
    %42 = vector.broadcast %41 : vector<2x8x1xf32> to vector<2x8x32xf32>
    %43 = arith.mulf %33, %42 : vector<2x8x32xf32>
    %44 = vector.shape_cast %25 : vector<1x32xf32> to vector<1x1x32xf32>
    %45 = vector.broadcast %44 : vector<1x1x32xf32> to vector<2x8x32xf32>
    %46 = arith.mulf %43, %45 : vector<2x8x32xf32>
    %47 = vector.shape_cast %27 : vector<1x32xf32> to vector<1x1x32xf32>
    %48 = vector.broadcast %47 : vector<1x1x32xf32> to vector<2x8x32xf32>
    %49 = arith.addf %46, %48 : vector<2x8x32xf32>
    %50 = vector.shape_cast %49 : vector<2x8x32xf32> to vector<16x32xf32>
    %c0_31 = arith.constant 0 : index
    %c0_32 = arith.constant 0 : index
    %c0_33 = arith.constant 0 : index
    %51 = vector.load %arg5[%c0_31, %c0_32, %c0_33] : memref<2x32x32xf32, #tpu.memory_space<vmem>>, vector<1x32x32xf32>
    %52 = vector.shape_cast %51 : vector<1x32x32xf32> to vector<32x32xf32>
    %cst_34 = arith.constant dense<0.000000e+00> : vector<16x32xf32>
    %53 = tpu.matmul %50, %52, %cst_34 {dimension_numbers = #tpu.dot_dimension_numbers<[1], [0], [0], [1], [0, 0, 1, 1], [], []>} : vector<16x32xf32>, vector<32x32xf32>, vector<16x32xf32> -> vector<16x32xf32>
    %54 = vector.shape_cast %53 : vector<16x32xf32> to vector<2x8x32xf32>
    %c0_35 = arith.constant 0 : index
    %c0_36 = arith.constant 0 : index
    %c0_37 = arith.constant 0 : index
    %55 = vector.load %arg6[%c0_35, %c0_36, %c0_37] : memref<2x1x32xf32, #tpu.memory_space<vmem>>, vector<1x1x32xf32>
    %56 = vector.shape_cast %55 : vector<1x1x32xf32> to vector<1x32xf32>
    %57 = vector.shape_cast %56 : vector<1x32xf32> to vector<1x1x32xf32>
    %58 = vector.broadcast %57 : vector<1x1x32xf32> to vector<2x8x32xf32>
    %59 = arith.addf %54, %58 : vector<2x8x32xf32>
    %60 = arith.addf %49, %59 : vector<2x8x32xf32>
    %c0_38 = arith.constant 0 : index
    %c0_39 = arith.constant 0 : index
    %c0_40 = arith.constant 0 : index
    %61 = vector.load %arg7[%c0_38, %c0_39, %c0_40] : memref<2x1x32xf32, #tpu.memory_space<vmem>>, vector<1x1x32xf32>
    %62 = vector.shape_cast %61 : vector<1x1x32xf32> to vector<1x32xf32>
    %c0_41 = arith.constant 0 : index
    %c0_42 = arith.constant 0 : index
    %c0_43 = arith.constant 0 : index
    %63 = vector.load %arg8[%c0_41, %c0_42, %c0_43] : memref<2x1x32xf32, #tpu.memory_space<vmem>>, vector<1x1x32xf32>
    %64 = vector.shape_cast %63 : vector<1x1x32xf32> to vector<1x32xf32>
    %cst_44 = arith.constant dense<0.000000e+00> : vector<2x8xf32>
    %65 = vector.multi_reduction <add>, %60, %cst_44 [2] : vector<2x8x32xf32> to vector<2x8xf32>
    %66 = vector.shape_cast %65 : vector<2x8xf32> to vector<2x8x1xf32>
    %cst_45 = arith.constant 3.200000e+01 : f32
    %67 = vector.broadcast %cst_45 : f32 to vector<2x8x1xf32>
    %68 = arith.divf %66, %67 : vector<2x8x1xf32>
    %69 = vector.broadcast %68 : vector<2x8x1xf32> to vector<2x8x32xf32>
    %70 = arith.subf %60, %69 : vector<2x8x32xf32>
    %71 = arith.mulf %70, %70 : vector<2x8x32xf32>
    %cst_46 = arith.constant dense<0.000000e+00> : vector<2x8xf32>
    %72 = vector.multi_reduction <add>, %71, %cst_46 [2] : vector<2x8x32xf32> to vector<2x8xf32>
    %73 = vector.shape_cast %72 : vector<2x8xf32> to vector<2x8x1xf32>
    %cst_47 = arith.constant 3.200000e+01 : f32
    %74 = vector.broadcast %cst_47 : f32 to vector<2x8x1xf32>
    %75 = arith.divf %73, %74 : vector<2x8x1xf32>
    %cst_48 = arith.constant 9.99999974E-6 : f32
    %76 = vector.broadcast %cst_48 : f32 to vector<2x8x1xf32>
    %77 = arith.addf %75, %76 : vector<2x8x1xf32>
    %78 = math.rsqrt %77 : vector<2x8x1xf32>
    %79 = vector.broadcast %78 : vector<2x8x1xf32> to vector<2x8x32xf32>
    %80 = arith.mulf %70, %79 : vector<2x8x32xf32>
    %81 = vector.shape_cast %62 : vector<1x32xf32> to vector<1x1x32xf32>
    %82 = vector.broadcast %81 : vector<1x1x32xf32> to vector<2x8x32xf32>
    %83 = arith.mulf %80, %82 : vector<2x8x32xf32>
    %84 = vector.shape_cast %64 : vector<1x32xf32> to vector<1x1x32xf32>
    %85 = vector.broadcast %84 : vector<1x1x32xf32> to vector<2x8x32xf32>
    %86 = arith.addf %83, %85 : vector<2x8x32xf32>
    %c0_49 = arith.constant 0 : index
    %c1_50 = arith.constant 1 : index
    %c0_51 = arith.constant 0 : index
    %87 = vector.load %arg10[%c0_49, %c1_50, %c0_51] : memref<2x10x32xf32, #tpu.memory_space<vmem>>, vector<2x8x32xf32>
    tpu.vector_store %arg10[%c0_49, %c1_50, %c0_51], %86 {strides = array<i32>} : memref<2x10x32xf32, #tpu.memory_space<vmem>>, vector<2x8x32xf32>,
    %c0_52 = arith.constant 0 : index
    %c0_53 = arith.constant 0 : index
    %c0_54 = arith.constant 0 : index
    %88 = vector.load %arg10[%c0_52, %c0_53, %c0_54] : memref<2x10x32xf32, #tpu.memory_space<vmem>>, vector<2x8x32xf32>
    %89 = vector.shape_cast %88 : vector<2x8x32xf32> to vector<16x32xf32>
    %c0_55 = arith.constant 0 : index
    %c1_56 = arith.constant 1 : index
    %c0_57 = arith.constant 0 : index
    %90 = vector.load %arg10[%c0_55, %c1_56, %c0_57] : memref<2x10x32xf32, #tpu.memory_space<vmem>>, vector<2x8x32xf32>
    %91 = vector.shape_cast %90 : vector<2x8x32xf32> to vector<16x32xf32>
    %c0_58 = arith.constant 0 : index
    %c2_59 = arith.constant 2 : index
    %c0_60 = arith.constant 0 : index
    %92 = vector.load %arg10[%c0_58, %c2_59, %c0_60] : memref<2x10x32xf32, #tpu.memory_space<vmem>>, vector<2x8x32xf32>
    %93 = vector.shape_cast %92 : vector<2x8x32xf32> to vector<16x32xf32>
    %94 = tpu.concatenate %89, %91, %93 in 1 : vector<16x32xf32>, vector<16x32xf32>, vector<16x32xf32> -> vector<16x96xf32>
    %c1_61 = arith.constant 1 : index
    %c0_62 = arith.constant 0 : index
    %c0_63 = arith.constant 0 : index
    %95 = vector.load %arg2[%c1_61, %c0_62, %c0_63] : memref<2x96x64xf32, #tpu.memory_space<vmem>>, vector<1x96x64xf32>
    %96 = vector.shape_cast %95 : vector<1x96x64xf32> to vector<96x64xf32>
    %cst_64 = arith.constant dense<0.000000e+00> : vector<16x64xf32>
    %97 = tpu.matmul %94, %96, %cst_64 {dimension_numbers = #tpu.dot_dimension_numbers<[1], [0], [0], [1], [0, 0, 1, 1], [], []>} : vector<16x96xf32>, vector<96x64xf32>, vector<16x64xf32> -> vector<16x64xf32>
    %98 = vector.extract_strided_slice %97 {offsets = [0, 0], sizes = [16, 32], strides = [1, 1]} : vector<16x64xf32> to vector<16x32xf32>
    %99 = vector.extract_strided_slice %97 {offsets = [0, 32], sizes = [16, 32], strides = [1, 1]} : vector<16x64xf32> to vector<16x32xf32>
    %100 = arith.negf %99 : vector<16x32xf32>
    %101 = math.exp %100 : vector<16x32xf32>
    %cst_65 = arith.constant 1.000000e+00 : f32
    %102 = vector.broadcast %cst_65 : f32 to vector<16x32xf32>
    %103 = arith.addf %102, %101 : vector<16x32xf32>
    %104 = arith.divf %102, %103 : vector<16x32xf32>
    %105 = arith.mulf %98, %104 : vector<16x32xf32>
    %106 = vector.shape_cast %105 : vector<16x32xf32> to vector<2x8x32xf32>
    %107 = arith.addf %106, %86 : vector<2x8x32xf32>
    %c1_66 = arith.constant 1 : index
    %c0_67 = arith.constant 0 : index
    %c0_68 = arith.constant 0 : index
    %108 = vector.load %arg3[%c1_66, %c0_67, %c0_68] : memref<2x1x32xf32, #tpu.memory_space<vmem>>, vector<1x1x32xf32>
    %109 = vector.shape_cast %108 : vector<1x1x32xf32> to vector<1x32xf32>
    %c1_69 = arith.constant 1 : index
    %c0_70 = arith.constant 0 : index
    %c0_71 = arith.constant 0 : index
    %110 = vector.load %arg4[%c1_69, %c0_70, %c0_71] : memref<2x1x32xf32, #tpu.memory_space<vmem>>, vector<1x1x32xf32>
    %111 = vector.shape_cast %110 : vector<1x1x32xf32> to vector<1x32xf32>
    %cst_72 = arith.constant dense<0.000000e+00> : vector<2x8xf32>
    %112 = vector.multi_reduction <add>, %107, %cst_72 [2] : vector<2x8x32xf32> to vector<2x8xf32>
    %113 = vector.shape_cast %112 : vector<2x8xf32> to vector<2x8x1xf32>
    %cst_73 = arith.constant 3.200000e+01 : f32
    %114 = vector.broadcast %cst_73 : f32 to vector<2x8x1xf32>
    %115 = arith.divf %113, %114 : vector<2x8x1xf32>
    %116 = vector.broadcast %115 : vector<2x8x1xf32> to vector<2x8x32xf32>
    %117 = arith.subf %107, %116 : vector<2x8x32xf32>
    %118 = arith.mulf %117, %117 : vector<2x8x32xf32>
    %cst_74 = arith.constant dense<0.000000e+00> : vector<2x8xf32>
    %119 = vector.multi_reduction <add>, %118, %cst_74 [2] : vector<2x8x32xf32> to vector<2x8xf32>
    %120 = vector.shape_cast %119 : vector<2x8xf32> to vector<2x8x1xf32>
    %cst_75 = arith.constant 3.200000e+01 : f32
    %121 = vector.broadcast %cst_75 : f32 to vector<2x8x1xf32>
    %122 = arith.divf %120, %121 : vector<2x8x1xf32>
    %cst_76 = arith.constant 9.99999974E-6 : f32
    %123 = vector.broadcast %cst_76 : f32 to vector<2x8x1xf32>
    %124 = arith.addf %122, %123 : vector<2x8x1xf32>
    %125 = math.rsqrt %124 : vector<2x8x1xf32>
    %126 = vector.broadcast %125 : vector<2x8x1xf32> to vector<2x8x32xf32>
    %127 = arith.mulf %117, %126 : vector<2x8x32xf32>
    %128 = vector.shape_cast %109 : vector<1x32xf32> to vector<1x1x32xf32>
    %129 = vector.broadcast %128 : vector<1x1x32xf32> to vector<2x8x32xf32>
    %130 = arith.mulf %127, %129 : vector<2x8x32xf32>
    %131 = vector.shape_cast %111 : vector<1x32xf32> to vector<1x1x32xf32>
    %132 = vector.broadcast %131 : vector<1x1x32xf32> to vector<2x8x32xf32>
    %133 = arith.addf %130, %132 : vector<2x8x32xf32>
    %134 = vector.shape_cast %133 : vector<2x8x32xf32> to vector<16x32xf32>
    %c1_77 = arith.constant 1 : index
    %c0_78 = arith.constant 0 : index
    %c0_79 = arith.constant 0 : index
    %135 = vector.load %arg5[%c1_77, %c0_78, %c0_79] : memref<2x32x32xf32, #tpu.memory_space<vmem>>, vector<1x32x32xf32>
    %136 = vector.shape_cast %135 : vector<1x32x32xf32> to vector<32x32xf32>
    %cst_80 = arith.constant dense<0.000000e+00> : vector<16x32xf32>
    %137 = tpu.matmul %134, %136, %cst_80 {dimension_numbers = #tpu.dot_dimension_numbers<[1], [0], [0], [1], [0, 0, 1, 1], [], []>} : vector<16x32xf32>, vector<32x32xf32>, vector<16x32xf32> -> vector<16x32xf32>
    %138 = vector.shape_cast %137 : vector<16x32xf32> to vector<2x8x32xf32>
    %c1_81 = arith.constant 1 : index
    %c0_82 = arith.constant 0 : index
    %c0_83 = arith.constant 0 : index
    %139 = vector.load %arg6[%c1_81, %c0_82, %c0_83] : memref<2x1x32xf32, #tpu.memory_space<vmem>>, vector<1x1x32xf32>
    %140 = vector.shape_cast %139 : vector<1x1x32xf32> to vector<1x32xf32>
    %141 = vector.shape_cast %140 : vector<1x32xf32> to vector<1x1x32xf32>
    %142 = vector.broadcast %141 : vector<1x1x32xf32> to vector<2x8x32xf32>
    %143 = arith.addf %138, %142 : vector<2x8x32xf32>
    %144 = arith.addf %133, %143 : vector<2x8x32xf32>
    %c1_84 = arith.constant 1 : index
    %c0_85 = arith.constant 0 : index
    %c0_86 = arith.constant 0 : index
    %145 = vector.load %arg7[%c1_84, %c0_85, %c0_86] : memref<2x1x32xf32, #tpu.memory_space<vmem>>, vector<1x1x32xf32>
    %146 = vector.shape_cast %145 : vector<1x1x32xf32> to vector<1x32xf32>
    %c1_87 = arith.constant 1 : index
    %c0_88 = arith.constant 0 : index
    %c0_89 = arith.constant 0 : index
    %147 = vector.load %arg8[%c1_87, %c0_88, %c0_89] : memref<2x1x32xf32, #tpu.memory_space<vmem>>, vector<1x1x32xf32>
    %148 = vector.shape_cast %147 : vector<1x1x32xf32> to vector<1x32xf32>
    %cst_90 = arith.constant dense<0.000000e+00> : vector<2x8xf32>
    %149 = vector.multi_reduction <add>, %144, %cst_90 [2] : vector<2x8x32xf32> to vector<2x8xf32>
    %150 = vector.shape_cast %149 : vector<2x8xf32> to vector<2x8x1xf32>
    %cst_91 = arith.constant 3.200000e+01 : f32
    %151 = vector.broadcast %cst_91 : f32 to vector<2x8x1xf32>
    %152 = arith.divf %150, %151 : vector<2x8x1xf32>
    %153 = vector.broadcast %152 : vector<2x8x1xf32> to vector<2x8x32xf32>
    %154 = arith.subf %144, %153 : vector<2x8x32xf32>
    %155 = arith.mulf %154, %154 : vector<2x8x32xf32>
    %cst_92 = arith.constant dense<0.000000e+00> : vector<2x8xf32>
    %156 = vector.multi_reduction <add>, %155, %cst_92 [2] : vector<2x8x32xf32> to vector<2x8xf32>
    %157 = vector.shape_cast %156 : vector<2x8xf32> to vector<2x8x1xf32>
    %cst_93 = arith.constant 3.200000e+01 : f32
    %158 = vector.broadcast %cst_93 : f32 to vector<2x8x1xf32>
    %159 = arith.divf %157, %158 : vector<2x8x1xf32>
    %cst_94 = arith.constant 9.99999974E-6 : f32
    %160 = vector.broadcast %cst_94 : f32 to vector<2x8x1xf32>
    %161 = arith.addf %159, %160 : vector<2x8x1xf32>
    %162 = math.rsqrt %161 : vector<2x8x1xf32>
    %163 = vector.broadcast %162 : vector<2x8x1xf32> to vector<2x8x32xf32>
    %164 = arith.mulf %154, %163 : vector<2x8x32xf32>
    %165 = vector.shape_cast %146 : vector<1x32xf32> to vector<1x1x32xf32>
    %166 = vector.broadcast %165 : vector<1x1x32xf32> to vector<2x8x32xf32>
    %167 = arith.mulf %164, %166 : vector<2x8x32xf32>
    %168 = vector.shape_cast %148 : vector<1x32xf32> to vector<1x1x32xf32>
    %169 = vector.broadcast %168 : vector<1x1x32xf32> to vector<2x8x32xf32>
    %170 = arith.addf %167, %169 : vector<2x8x32xf32>
    %c0_95 = arith.constant 0 : index
    %c0_96 = arith.constant 0 : index
    %c0_97 = arith.constant 0 : index
    %171 = vector.load %arg9[%c0_95, %c0_96, %c0_97] : memref<2x8x32xf32, #tpu.memory_space<vmem>>, vector<2x8x32xf32>
    tpu.vector_store %arg9[%c0_95, %c0_96, %c0_97], %170 {strides = array<i32>} : memref<2x8x32xf32, #tpu.memory_space<vmem>>, vector<2x8x32xf32>,
    return
  }
  func.func @transform_0(%arg0: i32) -> (i32, i32, i32) {
    %c0_i32 = arith.constant 0 : i32
    %c0_i32_0 = arith.constant 0 : i32
    %c0_i32_1 = arith.constant 0 : i32
    return %arg0, %c0_i32, %c0_i32_0 : i32, i32, i32
  }
  func.func @transform_1(%arg0: i32) -> (i32, i32, i32) {
    %c0_i32 = arith.constant 0 : i32
    %c0_i32_0 = arith.constant 0 : i32
    %c0_i32_1 = arith.constant 0 : i32
    %c0_i32_2 = arith.constant 0 : i32
    return %c0_i32, %c0_i32_0, %c0_i32_1 : i32, i32, i32
  }
  func.func @transform_2(%arg0: i32) -> (i32, i32, i32) {
    %c0_i32 = arith.constant 0 : i32
    %c0_i32_0 = arith.constant 0 : i32
    %c0_i32_1 = arith.constant 0 : i32
    %c0_i32_2 = arith.constant 0 : i32
    return %c0_i32, %c0_i32_0, %c0_i32_1 : i32, i32, i32
  }
  func.func @transform_3(%arg0: i32) -> (i32, i32, i32) {
    %c0_i32 = arith.constant 0 : i32
    %c0_i32_0 = arith.constant 0 : i32
    %c0_i32_1 = arith.constant 0 : i32
    %c0_i32_2 = arith.constant 0 : i32
    return %c0_i32, %c0_i32_0, %c0_i32_1 : i32, i32, i32
  }
  func.func @transform_4(%arg0: i32) -> (i32, i32, i32) {
    %c0_i32 = arith.constant 0 : i32
    %c0_i32_0 = arith.constant 0 : i32
    %c0_i32_1 = arith.constant 0 : i32
    %c0_i32_2 = arith.constant 0 : i32
    return %c0_i32, %c0_i32_0, %c0_i32_1 : i32, i32, i32
  }
  func.func @transform_5(%arg0: i32) -> (i32, i32, i32) {
    %c0_i32 = arith.constant 0 : i32
    %c0_i32_0 = arith.constant 0 : i32
    %c0_i32_1 = arith.constant 0 : i32
    %c0_i32_2 = arith.constant 0 : i32
    return %c0_i32, %c0_i32_0, %c0_i32_1 : i32, i32, i32
  }
  func.func @transform_6(%arg0: i32) -> (i32, i32, i32) {
    %c0_i32 = arith.constant 0 : i32
    %c0_i32_0 = arith.constant 0 : i32
    %c0_i32_1 = arith.constant 0 : i32
    %c0_i32_2 = arith.constant 0 : i32
    return %c0_i32, %c0_i32_0, %c0_i32_1 : i32, i32, i32
  }
  func.func @transform_7(%arg0: i32) -> (i32, i32, i32) {
    %c0_i32 = arith.constant 0 : i32
    %c0_i32_0 = arith.constant 0 : i32
    %c0_i32_1 = arith.constant 0 : i32
    %c0_i32_2 = arith.constant 0 : i32
    return %c0_i32, %c0_i32_0, %c0_i32_1 : i32, i32, i32
  }
  func.func @transform_8(%arg0: i32) -> (i32, i32, i32) {
    %c0_i32 = arith.constant 0 : i32
    %c0_i32_0 = arith.constant 0 : i32
    %c0_i32_1 = arith.constant 0 : i32
    return %arg0, %c0_i32, %c0_i32_0 : i32, i32, i32
  }
}

</mosaic_0001>

<bundles_post_ra>
// kernel: tpu_custom_call.1
= control target key start
LH: loop header
LB: loop body
LE: loop exit
PB: predicated region body
PF: predicated region fallthrough
CT: control target
= control target key end

     0   :  { %vm30_vm0 = vcmask 261120   ;;  %vm32_vm1 = vcmask 254976   ;;  %v729_v1 = vmov 0.0   ;;  %s1003_s0 = inlined_call_operand.vmem [shape: f32[2,8,32], index: 0, kind: input, shape index: {}]   ;;  %s1004_s1 = inlined_call_operand.vmem [shape: f32[2,96,64], index: 1, kind: input, shape index: {}]   ;;  %s1005_s2 = inlined_call_operand.vmem [shape: f32[2,1,32], index: 2, kind: input, shape index: {}]   ;;  %s1006_s3 = inlined_call_operand.vmem [shape: f32[2,1,32], index: 3, kind: input, shape index: {}]   ;;  %s1007_s4 = inlined_call_operand.vmem [shape: f32[2,32,32], index: 4, kind: input, shape index: {}]   ;;  %s1008_s5 = inlined_call_operand.vmem [shape: f32[2,1,32], index: 5, kind: input, shape index: {}]   ;;  %s1009_s6 = inlined_call_operand.vmem [shape: f32[2,1,32], index: 6, kind: input, shape index: {}]   ;;  %s1010_s7 = inlined_call_operand.vmem [shape: f32[2,1,32], index: 7, kind: input, shape index: {}]   ;;  %s1011_s8 = inlined_call_operand.hbm [shape: f32[2,8,32], index: 8, kind: output, shape index: {}]  }
   0x1   :  { %v785_v0 = vld [vmem:[%s1003_s0] sm:$0xff]  ;;  %31 = vst.msk [vmem:[#allocation2] sm:$0xff] %vm30_vm0, %v729_v1  ;;  %v78_v2 = vld [vmem:[%s1004_s1 + $0x58] sm:$0xff]  ;;  %v77_v3 = vld [vmem:[%s1004_s1 + $0x50] sm:$0xff] }
   0x2   :  { %33 = vst.msk [vmem:[#allocation2 + $0x8] sm:$0x3] %vm32_vm1, %v729_v1  ;;  %v797_v4 = vld [vmem:[%s1003_s0 + $0x8] sm:$0xff]  ;;  %90 = vmatpush.msra.mxu0 %v78_v2  ;;  %v75_v6 = vld [vmem:[%s1004_s1 + $0x40] sm:$0xff]  ;;  %v74_v7 = vld [vmem:[%s1004_s1 + $0x38] sm:$0xff] }
   0x3   :  { %38 = vst.msk [vmem:[#allocation2 + $0x1] sm:$0xff] %vm30_vm0, %v785_v0  ;;  %v76_v5 = vld [vmem:[%s1004_s1 + $0x48] sm:$0xff] }
   0x4   :  { %34 = vst.msk [vmem:[#allocation2 + $0x10] sm:$0xff] %vm30_vm0, %v729_v1  ;;  %91 = vmatpush.msra.mxu0 %v77_v3 }
   0x5   :  { %35 = vst.msk [vmem:[#allocation2 + $0x18] sm:$0x3] %vm32_vm1, %v729_v1 }
   0x6   :  { %39 = vst.msk [vmem:[#allocation2 + $0x11] sm:$0xff] %vm30_vm0, %v797_v4  ;;  %92 = vmatpush.msra.mxu0 %v76_v5 }
   0x7   :  { %13 = vsyncpa [#allocation4], 0  ;;  %v73_v8 = vld [vmem:[%s1004_s1 + $0x30] sm:$0xff]  ;;  %s730_s20 = smov 32   ;;  %v72_v10 = vld [vmem:[%s1004_s1 + $0x28] sm:$0xff]  ;;  %s731_s23 = smov 64  }
   0x8   :  { %93 = vmatpush.msra.mxu0 %v75_v6  ;;  %v71_v14 = vld [vmem:[%s1004_s1 + $0x20] sm:$0xff]  ;;  %v70_v15 = vld [vmem:[%s1004_s1 + $0x18] sm:$0xff]  ;;  %v69_v16 = vld [vmem:[%s1004_s1 + $0x10] sm:$0xff]  ;;  %vm64_vm2 = vcmask 523264   ;;  %vm79_vm3 = vcmask 785408   ;;  %s732_s12 = smov 96  }
   0x9   :  { %v68_v17 = vld [vmem:[%s1004_s1 + $0x8] sm:$0xff]  ;;  %v67_v18 = vld [vmem:[%s1004_s1] sm:$0xff]  ;;  %v733_v2 = vmov 32.0   ;;  %s606_s27 = sshll.u32 %s1011_s8, 4  ;;  %s736_s28 = smov 8   ;;  %s607_s27 = int_to_ptr.hbm [resolvable:$true] %s606_s27 }
   0xa   :  { %v42_v9 = vld [vmem:[#allocation2 + $0x1] sm:$0xff]  ;;  %94 = vmatpush.msra.mxu0 %v74_v7 }
   0xb   :  { %48 = vrot.lane.b32.xlu0 %v42_v9, %s730_s20  ;;  %v44_v12 = vld [vmem:[#allocation2 + $0x2] sm:$0xff] }
   0xc   :  { %95 = vmatpush.msra.mxu0 %v73_v8  ;;  %v40_v21 = vld [vmem:[#allocation2] sm:$0xff] }
   0xd   :  { %v43_v11 = vld [vmem:[#allocation2 + $0x11] sm:$0xff] }
   0xe   :  { %50 = vrot.lane.b32.xlu1 %v43_v11, %s730_s20  ;;  %96 = vmatpush.msra.mxu0 %v72_v10  ;;  %v45_v13 = vld [vmem:[#allocation2 + $0x12] sm:$0xff] }
   0xf   :  { %v41_v24 = vld [vmem:[#allocation2 + $0x10] sm:$0xff] }
  0x10   :  { %97 = vmatpush.msra.mxu0 %v71_v14 }
  0x12   :  { %98 = vmatpush.msra.mxu0 %v70_v15 }
  0x13   :  { %56 = vrot.lane.b32.xlu0 %v44_v12, %s731_s23 }
  0x14   :  { %99 = vmatpush.msra.mxu0 %v69_v16 }
  0x16   :  { %58 = vrot.lane.b32.xlu1 %v45_v13, %s731_s23  ;;  %100 = vmatpush.msra.mxu0 %v68_v17 }
  0x18   :  { %101 = vmatpush.msra.mxu0 %v67_v18  ;;  %v225_v18 = vld [vmem:[%s1007_s4 + $0x18] sm:$0xff] }
  0x19   :  { %244 = vmatpush.msra.mxu1 %v225_v18 }
  0x7d   :  { %v49_v19 = vpop.permute.xlu0 %48 }
  0x7e   :  { %v62_v22 = vsel %vm30_vm0, %v40_v21, %v49_v19  ;;  %v224_v19 = vld [vmem:[%s1007_s4 + $0x10] sm:$0xff]  ;;  %v222_v21 = vld [vmem:[%s1007_s4] sm:$0xff] }
  0x7f   :  { %245 = vmatpush.msra.mxu1 %v224_v19 }
  0x80   :  { %v51_v20 = vpop.permute.xlu1 %50 }
  0x81   :  { %v63_v26 = vsel %vm30_vm0, %v41_v24, %v51_v20  ;;  %v223_v20 = vld [vmem:[%s1007_s4 + $0x8] sm:$0xff] }
  0x82   :  { %246 = vmatpush.msra.mxu1 %v223_v20  ;;  %v662_v20 = vld [vmem:[%s1009_s6] ss:$0 sm:$0xff] }
  0x84   :  { %247 = vmatpush.msra.mxu1 %v222_v21 }
  0x85   :  { %v57_v23 = vpop.permute.xlu0 %56 }
  0x86   :  { %v65_v25 = vsel %vm64_vm2, %v62_v22, %v57_v23 }
  0x87   :  { %618 = vmatmul.msk.f32.vlgmr.msra.gmra.mxu0 %vm79_vm3, %v65_v25 }
  0x88   :  { %v59_v27 = vpop.permute.xlu1 %58 }
  0x89   :  { %v66_v28 = vsel %vm64_vm2, %v63_v26, %v59_v27 }
  0x8f   :  { %619 = vmatmul.msk.f32.gmra.mxu0 %vm79_vm3, %v66_v28 }
 0x104   :  { %v103_v29 = vpop.f32.mrf.mxu0 }
 0x105   :  { %v620_v30 = vmul.f32 -1.442695, %v103_v29 }
 0x107   :  { %669 = vpow2.f32 %v620_v30 }
 0x10c   :  { %v106_v31 = vpop.f32.mrf.mxu0 }
 0x10d   :  { %v670_v32 = vpop.eup %669  ;;  %v621_v33 = vmul.f32 -1.442695, %v106_v31 }
 0x10e   :  { %v115_v34 = vadd.f32 1.0, %v670_v32 }
 0x10f   :  { %671 = vpow2.f32 %v621_v33 }
 0x110   :  { %673 = vrcp.f32 %v115_v34  ;;  %v128_v40 = vand.u32 2147483648, %v115_v34  ;;  %v126_v42 = vand.u32 2147483647, %v115_v34  ;;  %vm122_vm5 = vweird.f32 %v115_v34 }
 0x112   :  { %v129_v45 = vor.u32 1.1754944e-38, %v128_v40  ;;  %vm127_vm7 = vcmp.eq.f32.partialorder %v126_v42, 8.507059e+37  ;;  %v660_v40 = vld [vmem:[%s1006_s3] ss:$0 sm:$0xff] }
 0x115   :  { %v672_v35 = vpop.eup %671 }
 0x116   :  { %v674_v36 = vpop.eup %673  ;;  %v116_v37 = vadd.f32 1.0, %v672_v35 }
 0x117   :  { %v118_v38 = vmul.f32 %v674_v36, %v115_v34  ;;  %vm123_vm4 = vweird.f32 %v674_v36 }
 0x118   :  { %675 = vrcp.f32 %v116_v37  ;;  %vm124_vm6 = vmor %vm122_vm5, %vm123_vm4  ;;  %v143_v49 = vand.u32 2147483648, %v116_v37  ;;  %vm137_vm8 = vweird.f32 %v116_v37  ;;  %v141_v51 = vand.u32 2147483647, %v116_v37 }
 0x119   :  { %v119_v39 = vsub.f32 1.0, %v118_v38  ;;  %677 = vrcp.f32 %v733_v2 }
 0x11a   :  { %v144_v53 = vor.u32 1.1754944e-38, %v143_v49  ;;  %vm142_vm11 = vcmp.eq.f32.partialorder %v141_v51, 8.507059e+37 }
 0x11b   :  { %v120_v41 = vmul.f32 %v674_v36, %v119_v39 }
 0x11d   :  { %v121_v43 = vadd.f32 %v674_v36, %v120_v41 }
 0x11e   :  { %v676_v44 = vpop.eup %675 }
 0x11f   :  { %v125_v46 = vsel %vm124_vm6, %v674_v36, %v121_v43  ;;  %v133_v47 = vmul.f32 %v676_v44, %v116_v37  ;;  %vm138_vm9 = vweird.f32 %v676_v44  ;;  %v678_v3 = vpop.eup %677  ;;  %v659_v36 = vld [vmem:[%s1005_s2] ss:$0 sm:$0xff] }
 0x120   :  { %v130_v48 = vsel %vm127_vm7, %v129_v45, %v125_v46  ;;  %vm139_vm10 = vmor %vm137_vm8, %vm138_vm9  ;;  %v168_v5 = vmul.f32 32.0, %v678_v3  ;;  %vm172_vm12 = vweird.f32 %v678_v3 }
 0x121   :  { %149 = vrot.lane.b32.xlu2 %v130_v48, %s732_s12  ;;  %v134_v50 = vsub.f32 1.0, %v133_v47 }
 0x122   :  { %v169_v6 = vsub.f32 1.0, %v168_v5 }
 0x123   :  { %v135_v52 = vmul.f32 %v676_v44, %v134_v50  ;;  %v661_v50 = vld [vmem:[%s1008_s5] ss:$0 sm:$0xff] }
 0x124   :  { %v170_v7 = vmul.f32 %v678_v3, %v169_v6 }
 0x125   :  { %v136_v54 = vadd.f32 %v676_v44, %v135_v52 }
 0x126   :  { %v171_v8 = vadd.f32 %v678_v3, %v170_v7 }
 0x127   :  { %v140_v55 = vsel %vm139_vm10, %v676_v44, %v136_v54 }
 0x128   :  { %v145_v56 = vsel %vm142_vm11, %v144_v53, %v140_v55  ;;  %v850_v9 = vsel %vm172_vm12, %v678_v3, %v171_v8 }
 0x129   :  { %151 = vrot.lane.b32.xlu2 %v145_v56, %s732_s12 }
 0x17b   :  { %v150_v57 = vpop.permute.xlu2 %149 }
 0x17c   :  { %v155_v58 = vmul.f32 %v150_v57, %v103_v29 }
 0x17e   :  { %v157_v59 = vadd.f32 %v155_v58, %v785_v0 }
 0x180   :  { %v161_v60 = vsel %vm30_vm0, %v157_v59, 0.0 }
 0x181   :  { %162 = vadd.xlane.f32.xlu0 %v161_v60 }
 0x183   :  { %v152_v61 = vpop.permute.xlu2 %151 }
 0x184   :  { %v156_v62 = vmul.f32 %v152_v61, %v106_v31 }
 0x186   :  { %v158_v63 = vadd.f32 %v156_v62, %v797_v4 }
 0x188   :  { %v164_v1 = vsel %vm30_vm0, %v158_v63, 0.0 }
 0x189   :  { %165 = vadd.xlane.f32.xlu1 %v164_v1 }
 0x1f4   :  { %v163_v0 = vpop.xlane.xlu0 %162 }
 0x1f5   :  { %v174_v10 = vmul.f32 %v850_v9, %v163_v0 }
 0x1f7   :  { %v176_v11 = vsub.f32 %v157_v59, %v174_v10 }
 0x1f9   :  { %v178_v12 = vmul.f32 %v176_v11, %v176_v11 }
 0x1fb   :  { %v180_v4 = vsel %vm30_vm0, %v178_v12, 0.0 }
 0x1fc   :  { %181 = vadd.xlane.f32.xlu2 %v180_v4  ;;  %v166_v13 = vpop.xlane.xlu1 %165 }
 0x1fd   :  { %v175_v14 = vmul.f32 %v850_v9, %v166_v13 }
 0x1ff   :  { %v177_v15 = vsub.f32 %v158_v63, %v175_v14 }
 0x201   :  { %v179_v16 = vmul.f32 %v177_v15, %v177_v15 }
 0x203   :  { %v183_v17 = vsel %vm30_vm0, %v179_v16, 0.0 }
 0x204   :  { %184 = vadd.xlane.f32.xlu2 %v183_v17 }
 0x26f   :  { %v182_v22 = vpop.xlane.xlu2 %181 }
 0x270   :  { %v186_v23 = vmul.f32 %v182_v22, %v850_v9 }
 0x272   :  { %v188_v24 = vadd.f32 1e-05, %v186_v23  ;;  %v663_v23 = vld [vmem:[%s1010_s7] ss:$0 sm:$0xff] }
 0x274   :  { %679 = vrsqrt.f32 %v188_v24  ;;  %vm196_vm14 = vweird.f32 %v188_v24 }
 0x277   :  { %v185_v25 = vpop.xlane.xlu2 %184 }
 0x278   :  { %v187_v26 = vmul.f32 %v185_v25, %v850_v9 }
 0x27a   :  { %v680_v27 = vpop.eup %679  ;;  %v189_v28 = vadd.f32 1e-05, %v187_v26 }
 0x27b   :  { %v191_v29 = vmul.f32 %v680_v27, %v188_v24  ;;  %vm197_vm13 = vweird.f32 %v680_v27 }
 0x27c   :  { %681 = vrsqrt.f32 %v189_v28  ;;  %vm198_vm15 = vmor %vm196_vm14, %vm197_vm13  ;;  %vm206_vm4 = vweird.f32 %v189_v28 }
 0x27d   :  { %v192_v30 = vmul.f32 %v680_v27, %v191_v29 }
 0x27f   :  { %v193_v31 = vmul.f32 0.5, %v192_v30 }
 0x281   :  { %v194_v32 = vsub.f32 1.5, %v193_v31 }
 0x282   :  { %v682_v33 = vpop.eup %681 }
 0x283   :  { %v195_v34 = vmul.f32 %v680_v27, %v194_v32  ;;  %v201_v35 = vmul.f32 %v682_v33, %v189_v28  ;;  %vm207_vm1 = vweird.f32 %v682_v33 }
 0x284   :  { %vm208_vm5 = vmor %vm206_vm4, %vm207_vm1 }
 0x285   :  { %v199_v37 = vsel %vm198_vm15, %v680_v27, %v195_v34  ;;  %v202_v38 = vmul.f32 %v682_v33, %v201_v35 }
 0x286   :  { %v210_v39 = vmul.f32 %v199_v37, %v176_v11 }
 0x287   :  { %v203_v41 = vmul.f32 0.5, %v202_v38  ;;  %v635_v38 = vld [vmem:[%s1004_s1 + $0xb8] sm:$0xff] }
 0x288   :  { %v215_v42 = vmul.f32 %v659_v36, %v210_v39  ;;  %v634_v39 = vld [vmem:[%s1004_s1 + $0xb0] sm:$0xff]  ;;  %370 = vmatpush.msra.mxu2 %v635_v38 }
 0x289   :  { %v204_v43 = vsub.f32 1.5, %v203_v41  ;;  %v632_v41 = vld [vmem:[%s1004_s1 + $0xa0] sm:$0xff] }
 0x28a   :  { %v220_v44 = vadd.f32 %v660_v40, %v215_v42  ;;  %371 = vmatpush.msra.mxu2 %v634_v39  ;;  %v631_v42 = vld [vmem:[%s1004_s1 + $0x98] sm:$0xff] }
 0x28b   :  { %v205_v45 = vmul.f32 %v682_v33, %v204_v43  ;;  %v630_v43 = vld [vmem:[%s1004_s1 + $0x90] sm:$0xff] }
 0x28c   :  { %622 = vmatmul.msk.f32.vlgmr.msra.gmra.mxu1 %vm30_vm0, %v220_v44 }
 0x28d   :  { %v209_v46 = vsel %vm208_vm5, %v682_v33, %v205_v45  ;;  %v628_v45 = vld [vmem:[%s1004_s1 + $0x80] sm:$0xff] }
 0x28e   :  { %v211_v47 = vmul.f32 %v209_v46, %v177_v15  ;;  %v627_v46 = vld [vmem:[%s1004_s1 + $0x78] sm:$0xff] }
 0x290   :  { %v216_v48 = vmul.f32 %v659_v36, %v211_v47  ;;  %v626_v47 = vld [vmem:[%s1004_s1 + $0x70] sm:$0xff] }
 0x292   :  { %v221_v49 = vadd.f32 %v660_v40, %v216_v48  ;;  %v633_v40 = vld [vmem:[%s1004_s1 + $0xa8] sm:$0xff] }
 0x293   :  { %372 = vmatpush.msra.mxu2 %v633_v40  ;;  %v625_v48 = vld [vmem:[%s1004_s1 + $0x68] sm:$0xff] }
 0x294   :  { %623 = vmatmul.msk.f32.gmra.mxu1 %vm30_vm0, %v221_v49 }
 0x295   :  { %373 = vmatpush.msra.mxu2 %v632_v41 }
 0x297   :  { %374 = vmatpush.msra.mxu2 %v631_v42 }
 0x299   :  { %375 = vmatpush.msra.mxu2 %v630_v43 }
 0x309   :  { %v249_v51 = vpop.f32.mrf.mxu1 }
 0x30a   :  { %v259_v52 = vadd.f32 %v661_v50, %v249_v51 }
 0x30c   :  { %v261_v53 = vadd.f32 %v259_v52, %v220_v44  ;;  %v629_v44 = vld [vmem:[%s1004_s1 + $0x88] sm:$0xff] }
 0x30d   :  { %376 = vmatpush.msra.mxu2 %v629_v44 }
 0x30e   :  { %v265_v54 = vsel %vm30_vm0, %v261_v53, 0.0 }
 0x30f   :  { %266 = vadd.xlane.f32.xlu0 %v265_v54  ;;  %377 = vmatpush.msra.mxu2 %v628_v45  ;;  %v645_v45 = vld [vmem:[%s1007_s4 + $0x38] sm:$0xff] }
 0x310   :  { %520 = vmatpush.msra.mxu3 %v645_v45  ;;  %v667_v45 = vld [vmem:[%s1009_s6 + $0x1] ss:$0 sm:$0xff]  ;;  %s734_s6 = smov [#allocation3]  }
 0x311   :  { %v252_v55 = vpop.f32.mrf.mxu1  ;;  %378 = vmatpush.msra.mxu2 %v627_v46  ;;  %v644_v46 = vld [vmem:[%s1007_s4 + $0x30] sm:$0xff]  ;;  %s604_s24 = sshll.u32 %s734_s6, 4  ;;  %s605_s24 = int_to_ptr.vmem [resolvable:$true] %s604_s24 }
 0x312   :  { %v260_v56 = vadd.f32 %v661_v50, %v252_v55  ;;  %521 = vmatpush.msra.mxu3 %v644_v46 }
 0x313   :  { %379 = vmatpush.msra.mxu2 %v626_v47 }
 0x314   :  { %v262_v57 = vadd.f32 %v260_v56, %v221_v49  ;;  %v624_v49 = vld [vmem:[%s1004_s1 + $0x60] sm:$0xff] }
 0x315   :  { %380 = vmatpush.msra.mxu2 %v625_v48  ;;  %v643_v48 = vld [vmem:[%s1007_s4 + $0x28] sm:$0xff] }
 0x316   :  { %v268_v58 = vsel %vm30_vm0, %v262_v57, 0.0  ;;  %522 = vmatpush.msra.mxu3 %v643_v48  ;;  %v668_v48 = vld [vmem:[%s1010_s7 + $0x1] ss:$0 sm:$0xff]  ;;  %s735_s7 = smov 128  }
 0x317   :  { %269 = vadd.xlane.f32.xlu1 %v268_v58  ;;  %381 = vmatpush.msra.mxu2 %v624_v49  ;;  %v642_v49 = vld [vmem:[%s1007_s4 + $0x20] sm:$0xff] }
 0x318   :  { %523 = vmatpush.msra.mxu3 %v642_v49 }
 0x382   :  { %v267_v59 = vpop.xlane.xlu0 %266 }
 0x383   :  { %v271_v60 = vmul.f32 %v267_v59, %v850_v9 }
 0x385   :  { %v273_v61 = vsub.f32 %v261_v53, %v271_v60 }
 0x387   :  { %v275_v62 = vmul.f32 %v273_v61, %v273_v61 }
 0x389   :  { %v277_v63 = vsel %vm30_vm0, %v275_v62, 0.0 }
 0x38a   :  { %278 = vadd.xlane.f32.xlu2 %v277_v63  ;;  %v270_v1 = vpop.xlane.xlu1 %269 }
 0x38b   :  { %v272_v2 = vmul.f32 %v270_v1, %v850_v9 }
 0x38d   :  { %v274_v3 = vsub.f32 %v262_v57, %v272_v2 }
 0x38f   :  { %v276_v5 = vmul.f32 %v274_v3, %v274_v3 }
 0x391   :  { %v280_v6 = vsel %vm30_vm0, %v276_v5, 0.0 }
 0x392   :  { %281 = vadd.xlane.f32.xlu0 %v280_v6 }
 0x3fd   :  { %v279_v7 = vpop.xlane.xlu2 %278 }
 0x3fe   :  { %v283_v8 = vmul.f32 %v279_v7, %v850_v9 }
 0x400   :  { %v285_v0 = vadd.f32 1e-05, %v283_v8 }
 0x402   :  { %683 = vrsqrt.f32 %v285_v0  ;;  %vm293_vm7 = vweird.f32 %v285_v0 }
 0x405   :  { %v282_v10 = vpop.xlane.xlu0 %281 }
 0x406   :  { %v284_v11 = vmul.f32 %v282_v10, %v850_v9 }
 0x408   :  { %v684_v12 = vpop.eup %683  ;;  %v286_v4 = vadd.f32 1e-05, %v284_v11 }
 0x409   :  { %v288_v13 = vmul.f32 %v684_v12, %v285_v0  ;;  %vm294_vm6 = vweird.f32 %v684_v12 }
 0x40a   :  { %685 = vrsqrt.f32 %v286_v4  ;;  %vm295_vm8 = vmor %vm293_vm7, %vm294_vm6  ;;  %vm303_vm10 = vweird.f32 %v286_v4 }
 0x40b   :  { %v289_v14 = vmul.f32 %v684_v12, %v288_v13 }
 0x40d   :  { %v290_v15 = vmul.f32 0.5, %v289_v14 }
 0x40f   :  { %v291_v16 = vsub.f32 1.5, %v290_v15 }
 0x410   :  { %v686_v17 = vpop.eup %685 }
 0x411   :  { %v292_v18 = vmul.f32 %v684_v12, %v291_v16  ;;  %v298_v19 = vmul.f32 %v686_v17, %v286_v4  ;;  %vm304_vm9 = vweird.f32 %v686_v17 }
 0x412   :  { %vm305_vm11 = vmor %vm303_vm10, %vm304_vm9 }
 0x413   :  { %v296_v21 = vsel %vm295_vm8, %v684_v12, %v292_v18  ;;  %v299_v22 = vmul.f32 %v686_v17, %v298_v19 }
 0x414   :  { %v307_v24 = vmul.f32 %v296_v21, %v273_v61 }
 0x415   :  { %v300_v25 = vmul.f32 0.5, %v299_v22 }
 0x416   :  { %v312_v26 = vmul.f32 %v662_v20, %v307_v24 }
 0x417   :  { %v301_v27 = vsub.f32 1.5, %v300_v25 }
 0x418   :  { %v895_v28 = vadd.f32 %v663_v23, %v312_v26 }
 0x419   :  { %v302_v29 = vmul.f32 %v686_v17, %v301_v27 }
 0x41a   :  { %319 = vst.msk [vmem:[#allocation2 + $0x1] sm:$0xff] %vm30_vm0, %v895_v28 }
 0x41b   :  { %v306_v30 = vsel %vm305_vm11, %v686_v17, %v302_v29 }
 0x41c   :  { %v308_v31 = vmul.f32 %v306_v30, %v274_v3 }
 0x41e   :  { %v313_v32 = vmul.f32 %v662_v20, %v308_v31 }
 0x420   :  { %v899_v33 = vadd.f32 %v663_v23, %v313_v32 }
 0x421   :  { %v325_v34 = vld [vmem:[#allocation2 + $0x2] sm:$0xff] }
 0x422   :  { %v323_v35 = vld [vmem:[#allocation2 + $0x1] sm:$0xff]  ;;  %320 = vst.msk [vmem:[#allocation2 + $0x11] sm:$0xff] %vm30_vm0, %v899_v33  ;;  %337 = vrot.lane.b32.xlu2 %v325_v34, %s731_s23 }
 0x423   :  { %329 = vrot.lane.b32.xlu1 %v323_v35, %s730_s20  ;;  %v321_v51 = vld [vmem:[#allocation2] sm:$0xff] }
 0x429   :  { %v324_v36 = vld [vmem:[#allocation2 + $0x11] sm:$0xff] }
 0x42a   :  { %v326_v37 = vld [vmem:[#allocation2 + $0x12] sm:$0xff]  ;;  %331 = vrot.lane.b32.xlu0 %v324_v36, %s730_s20 }
 0x42b   :  { %339 = vrot.lane.b32.xlu1 %v326_v37, %s731_s23  ;;  %v322_v56 = vld [vmem:[#allocation2 + $0x10] sm:$0xff] }
 0x47c   :  { %v338_v52 = vpop.permute.xlu2 %337 }
 0x495   :  { %v330_v50 = vpop.permute.xlu1 %329 }
 0x496   :  { %v343_v53 = vsel %vm30_vm0, %v321_v51, %v330_v50 }
 0x497   :  { %v345_v54 = vsel %vm64_vm2, %v343_v53, %v338_v52 }
 0x498   :  { %636 = vmatmul.msk.f32.vlgmr.msra.gmra.mxu2 %vm79_vm3, %v345_v54 }
 0x49c   :  { %v332_v55 = vpop.permute.xlu0 %331 }
 0x49d   :  { %v340_v57 = vpop.permute.xlu1 %339  ;;  %v344_v58 = vsel %vm30_vm0, %v322_v56, %v332_v55 }
 0x49e   :  { %v346_v59 = vsel %vm64_vm2, %v344_v58, %v340_v57 }
 0x4a0   :  { %637 = vmatmul.msk.f32.gmra.mxu2 %vm79_vm3, %v346_v59 }
 0x51b   :  { %v383_v60 = vpop.f32.mrf.mxu2 }
 0x51c   :  { %v638_v61 = vmul.f32 -1.442695, %v383_v60 }
 0x51e   :  { %687 = vpow2.f32 %v638_v61 }
 0x523   :  { %v386_v62 = vpop.f32.mrf.mxu2 }
 0x524   :  { %v688_v63 = vpop.eup %687  ;;  %v639_v1 = vmul.f32 -1.442695, %v386_v62 }
 0x525   :  { %v395_v2 = vadd.f32 1.0, %v688_v63 }
 0x526   :  { %689 = vpow2.f32 %v639_v1 }
 0x527   :  { %691 = vrcp.f32 %v395_v2  ;;  %v408_v0 = vand.u32 2147483648, %v395_v2  ;;  %v406_v11 = vand.u32 2147483647, %v395_v2  ;;  %vm402_vm3 = vweird.f32 %v395_v2 }
 0x529   :  { %v409_v13 = vor.u32 1.1754944e-38, %v408_v0  ;;  %vm407_vm13 = vcmp.eq.f32.partialorder %v406_v11, 8.507059e+37 }
 0x52c   :  { %v690_v3 = vpop.eup %689 }
 0x52d   :  { %v692_v5 = vpop.eup %691  ;;  %v396_v6 = vadd.f32 1.0, %v690_v3 }
 0x52e   :  { %v398_v7 = vmul.f32 %v692_v5, %v395_v2  ;;  %vm403_vm2 = vweird.f32 %v692_v5 }
 0x52f   :  { %693 = vrcp.f32 %v396_v6  ;;  %vm404_vm12 = vmor %vm402_vm3, %vm403_vm2  ;;  %v423_v18 = vand.u32 2147483648, %v396_v6  ;;  %v421_v20 = vand.u32 2147483647, %v396_v6  ;;  %vm417_vm15 = vweird.f32 %v396_v6 }
 0x530   :  { %v399_v8 = vsub.f32 1.0, %v398_v7 }
 0x531   :  { %v424_v22 = vor.u32 1.1754944e-38, %v423_v18  ;;  %vm422_vm4 = vcmp.eq.f32.partialorder %v421_v20, 8.507059e+37 }
 0x532   :  { %v400_v10 = vmul.f32 %v692_v5, %v399_v8  ;;  %v665_v8 = vld [vmem:[%s1006_s3 + $0x1] ss:$0 sm:$0xff] }
 0x534   :  { %v401_v12 = vadd.f32 %v692_v5, %v400_v10 }
 0x535   :  { %v694_v4 = vpop.eup %693 }
 0x536   :  { %v405_v14 = vsel %vm404_vm12, %v692_v5, %v401_v12  ;;  %v413_v15 = vmul.f32 %v694_v4, %v396_v6  ;;  %vm418_vm14 = vweird.f32 %v694_v4  ;;  %v664_v5 = vld [vmem:[%s1005_s2 + $0x1] ss:$0 sm:$0xff] }
 0x537   :  { %v410_v16 = vsel %vm407_vm13, %v409_v13, %v405_v14  ;;  %vm419_vm1 = vmor %vm417_vm15, %vm418_vm14 }
 0x538   :  { %429 = vrot.lane.b32.xlu0 %v410_v16, %s732_s12  ;;  %v414_v17 = vsub.f32 1.0, %v413_v15 }
 0x53a   :  { %v415_v19 = vmul.f32 %v694_v4, %v414_v17 }
 0x53c   :  { %v416_v21 = vadd.f32 %v694_v4, %v415_v19 }
 0x53e   :  { %v420_v23 = vsel %vm419_vm1, %v694_v4, %v416_v21  ;;  %v666_v4 = vld [vmem:[%s1008_s5 + $0x1] ss:$0 sm:$0xff] }
 0x53f   :  { %v425_v24 = vsel %vm422_vm4, %v424_v22, %v420_v23 }
 0x540   :  { %431 = vrot.lane.b32.xlu2 %v425_v24, %s732_s12 }
 0x59a   :  { %v432_v25 = vpop.permute.xlu2 %431 }
 0x59b   :  { %v436_v26 = vmul.f32 %v432_v25, %v386_v62 }
 0x59d   :  { %v438_v27 = vadd.f32 %v436_v26, %v899_v33 }
 0x59f   :  { %v446_v29 = vsel %vm30_vm0, %v438_v27, 0.0 }
 0x5a0   :  { %447 = vadd.xlane.f32.xlu0 %v446_v29 }
 0x5aa   :  { %v430_v30 = vpop.permute.xlu0 %429 }
 0x5ab   :  { %v435_v31 = vmul.f32 %v430_v30, %v383_v60 }
 0x5ad   :  { %v437_v32 = vadd.f32 %v435_v31, %v895_v28 }
 0x5af   :  { %v443_v34 = vsel %vm30_vm0, %v437_v32, 0.0 }
 0x5b0   :  { %444 = vadd.xlane.f32.xlu1 %v443_v34 }
 0x613   :  { %v448_v35 = vpop.xlane.xlu0 %447 }
 0x614   :  { %v450_v36 = vmul.f32 %v448_v35, %v850_v9 }
 0x616   :  { %v452_v37 = vsub.f32 %v438_v27, %v450_v36 }
 0x618   :  { %v454_v38 = vmul.f32 %v452_v37, %v452_v37 }
 0x61a   :  { %v458_v39 = vsel %vm30_vm0, %v454_v38, 0.0 }
 0x61b   :  { %459 = vadd.xlane.f32.xlu1 %v458_v39 }
 0x623   :  { %v445_v40 = vpop.xlane.xlu1 %444 }
 0x624   :  { %v449_v33 = vmul.f32 %v445_v40, %v850_v9 }
 0x626   :  { %v451_v41 = vsub.f32 %v437_v32, %v449_v33 }
 0x628   :  { %v453_v42 = vmul.f32 %v451_v41, %v451_v41 }
 0x62a   :  { %v455_v43 = vsel %vm30_vm0, %v453_v42, 0.0 }
 0x62b   :  { %456 = vadd.xlane.f32.xlu2 %v455_v43 }
 0x68e   :  { %v460_v28 = vpop.xlane.xlu1 %459 }
 0x68f   :  { %v462_v44 = vmul.f32 %v460_v28, %v850_v9 }
 0x691   :  { %v464_v47 = vadd.f32 1e-05, %v462_v44 }
 0x693   :  { %695 = vrsqrt.f32 %v464_v47  ;;  %vm481_vm9 = vweird.f32 %v464_v47 }
 0x699   :  { %v696_v51 = vpop.eup %695 }
 0x69a   :  { %v476_v54 = vmul.f32 %v696_v51, %v464_v47  ;;  %vm482_vm6 = vweird.f32 %v696_v51 }
 0x69b   :  { %vm483_vm10 = vmor %vm481_vm9, %vm482_vm6 }
 0x69c   :  { %v477_v55 = vmul.f32 %v696_v51, %v476_v54 }
 0x69e   :  { %v457_v50 = vpop.xlane.xlu2 %456  ;;  %v478_v57 = vmul.f32 0.5, %v477_v55 }
 0x69f   :  { %v461_v52 = vmul.f32 %v457_v50, %v850_v9 }
 0x6a0   :  { %v479_v60 = vsub.f32 1.5, %v478_v57 }
 0x6a1   :  { %v463_v53 = vadd.f32 1e-05, %v461_v52 }
 0x6a2   :  { %v480_v63 = vmul.f32 %v696_v51, %v479_v60 }
 0x6a3   :  { %697 = vrsqrt.f32 %v463_v53  ;;  %vm471_vm7 = vweird.f32 %v463_v53 }
 0x6a4   :  { %v484_v6 = vsel %vm483_vm10, %v696_v51, %v480_v63 }
 0x6a5   :  { %v486_v10 = vmul.f32 %v484_v6, %v452_v37 }
 0x6a7   :  { %v491_v11 = vmul.f32 %v664_v5, %v486_v10 }
 0x6a9   :  { %v698_v56 = vpop.eup %697  ;;  %v496_v12 = vadd.f32 %v665_v8, %v491_v11 }
 0x6aa   :  { %v466_v58 = vmul.f32 %v698_v56, %v463_v53  ;;  %vm472_vm5 = vweird.f32 %v698_v56 }
 0x6ab   :  { %vm473_vm8 = vmor %vm471_vm7, %vm472_vm5 }
 0x6ac   :  { %v467_v59 = vmul.f32 %v698_v56, %v466_v58 }
 0x6ae   :  { %v468_v61 = vmul.f32 0.5, %v467_v59 }
 0x6b0   :  { %v469_v62 = vsub.f32 1.5, %v468_v61 }
 0x6b2   :  { %v470_v1 = vmul.f32 %v698_v56, %v469_v62 }
 0x6b4   :  { %v474_v2 = vsel %vm473_vm8, %v698_v56, %v470_v1 }
 0x6b5   :  { %v485_v3 = vmul.f32 %v474_v2, %v451_v41 }
 0x6b7   :  { %v490_v7 = vmul.f32 %v664_v5, %v485_v3 }
 0x6b9   :  { %v495_v0 = vadd.f32 %v665_v8, %v490_v7 }
 0x6bb   :  { %646 = vmatmul.msk.f32.vlgmr.msra.gmra.mxu3 %vm30_vm0, %v495_v0 }
 0x6c3   :  { %647 = vmatmul.msk.f32.gmra.mxu3 %vm30_vm0, %v496_v12 }
 0x73e   :  { %v525_v13 = vpop.f32.mrf.mxu3 }
 0x73f   :  { %v536_v14 = vadd.f32 %v666_v4, %v525_v13 }
 0x741   :  { %v538_v15 = vadd.f32 %v536_v14, %v495_v0 }
 0x743   :  { %v544_v16 = vsel %vm30_vm0, %v538_v15, 0.0 }
 0x744   :  { %545 = vadd.xlane.f32.xlu0 %v544_v16 }
 0x746   :  { %v528_v17 = vpop.f32.mrf.mxu3 }
 0x747   :  { %v537_v18 = vadd.f32 %v666_v4, %v528_v17 }
 0x749   :  { %v539_v19 = vadd.f32 %v537_v18, %v496_v12 }
 0x74b   :  { %v547_v20 = vsel %vm30_vm0, %v539_v19, 0.0 }
 0x74c   :  { %548 = vadd.xlane.f32.xlu2 %v547_v20 }
 0x7b7   :  { %v546_v21 = vpop.xlane.xlu0 %545 }
 0x7b8   :  { %v550_v22 = vmul.f32 %v546_v21, %v850_v9 }
 0x7ba   :  { %v552_v23 = vsub.f32 %v538_v15, %v550_v22 }
 0x7bc   :  { %v554_v24 = vmul.f32 %v552_v23, %v552_v23 }
 0x7be   :  { %v556_v25 = vsel %vm30_vm0, %v554_v24, 0.0 }
 0x7bf   :  { %557 = vadd.xlane.f32.xlu1 %v556_v25  ;;  %v549_v26 = vpop.xlane.xlu2 %548 }
 0x7c0   :  { %v551_v27 = vmul.f32 %v549_v26, %v850_v9 }
 0x7c2   :  { %v553_v29 = vsub.f32 %v539_v19, %v551_v27 }
 0x7c4   :  { %v555_v30 = vmul.f32 %v553_v29, %v553_v29 }
 0x7c6   :  { %v559_v31 = vsel %vm30_vm0, %v555_v30, 0.0 }
 0x7c7   :  { %560 = vadd.xlane.f32.xlu0 %v559_v31 }
 0x832   :  { %v558_v32 = vpop.xlane.xlu1 %557 }
 0x833   :  { %v562_v34 = vmul.f32 %v558_v32, %v850_v9 }
 0x835   :  { %v564_v35 = vadd.f32 1e-05, %v562_v34 }
 0x837   :  { %699 = vrsqrt.f32 %v564_v35  ;;  %vm572_vm2 = vweird.f32 %v564_v35 }
 0x83a   :  { %v561_v36 = vpop.xlane.xlu0 %560 }
 0x83b   :  { %v563_v37 = vmul.f32 %v561_v36, %v850_v9 }
 0x83d   :  { %v700_v38 = vpop.eup %699  ;;  %v565_v39 = vadd.f32 1e-05, %v563_v37 }
 0x83e   :  { %v567_v40 = vmul.f32 %v700_v38, %v564_v35  ;;  %vm573_vm11 = vweird.f32 %v700_v38 }
 0x83f   :  { %701 = vrsqrt.f32 %v565_v39  ;;  %vm574_vm3 = vmor %vm572_vm2, %vm573_vm11  ;;  %vm582_vm13 = vweird.f32 %v565_v39 }
 0x840   :  { %v568_v33 = vmul.f32 %v700_v38, %v567_v40 }
 0x842   :  { %v569_v41 = vmul.f32 0.5, %v568_v33 }
 0x844   :  { %v570_v42 = vsub.f32 1.5, %v569_v41 }
 0x845   :  { %v702_v43 = vpop.eup %701 }
 0x846   :  { %v571_v28 = vmul.f32 %v700_v38, %v570_v42  ;;  %v577_v44 = vmul.f32 %v702_v43, %v565_v39  ;;  %vm583_vm12 = vweird.f32 %v702_v43 }
 0x847   :  { %vm584_vm14 = vmor %vm582_vm13, %vm583_vm12 }
 0x848   :  { %v575_v46 = vsel %vm574_vm3, %v700_v38, %v571_v28  ;;  %v578_v47 = vmul.f32 %v702_v43, %v577_v44 }
 0x849   :  { %v586_v9 = vmul.f32 %v575_v46, %v552_v23 }
 0x84a   :  { %v579_v49 = vmul.f32 0.5, %v578_v47 }
 0x84b   :  { %v591_v50 = vmul.f32 %v667_v45, %v586_v9 }
 0x84c   :  { %v580_v51 = vsub.f32 1.5, %v579_v49 }
 0x84d   :  { %v596_v52 = vadd.f32 %v668_v48, %v591_v50 }
 0x84e   :  { %v581_v53 = vmul.f32 %v702_v43, %v580_v51 }
 0x84f   :  { %598 = vst.msk [vmem:[#allocation3] sm:$0xff] %vm30_vm0, %v596_v52 }
 0x850   :  { %v585_v54 = vsel %vm584_vm14, %v702_v43, %v581_v53 }
 0x851   :  { %v587_v55 = vmul.f32 %v585_v54, %v553_v29 }
 0x853   :  { %v592_v56 = vmul.f32 %v667_v45, %v587_v55 }
 0x855   :  { %v597_v57 = vadd.f32 %v668_v48, %v592_v56 }
 0x857   :  { %599 = vst.msk [vmem:[#allocation3 + $0x8] sm:$0xff] %vm30_vm0, %v597_v57 }
 0x858   :  { %612 = dma.vmem_to_hbm [thread:$0]  %s605_s24, 256, %s607_s27, [#allocation4], %s735_s7, %s735_s7, %s736_s28  }
 0x859   :  { %727 = dma.done.wait [#allocation4], 256  }
 0x85a   :  { %728 = vsyncadd [#allocation4], 4294967040 }
 0x85b   :  { %617 = vsyncpa [#allocation4], 1 }

</bundles_post_ra>
